<compile_context>
chip_gen: v6e
topology: v6e:2x2x1
jax: 0.10.0
libtpu: 0.0.40
codegen_flags: <defaults>
</compile_context>

<pallas_src>
import jax
import jax.numpy as jnp
from jax.experimental import pallas as pl
from jax.experimental.pallas import tpu as pltpu


# ---------------------------------------------------------------------------
# Kernels
# ---------------------------------------------------------------------------

def _iwt_fused_kernel(x_ref, o_ref):
    """Butterfly + in-register 2x2 parity interleave.

    x_ref: (1, 4, th, W)   four sub-band tiles; rows are the flattened (C*H) axis.
    o_ref: (1, th, 4*W)    per input row r=(c,i): [ h[c,2i, 0:2W] | h[c,2i+1, 0:2W] ]
    """
    x1 = x_ref[0, 0].astype(jnp.float32)
    x2 = x_ref[0, 1].astype(jnp.float32)
    x3 = x_ref[0, 2].astype(jnp.float32)
    x4 = x_ref[0, 3].astype(jnp.float32)

    # Butterfly: 8 add/sub + 4 mul instead of 12 add/sub + 4 mul.
    a = x1 + x2
    b = x1 - x2
    c = x3 + x4
    d = x3 - x4

    r00 = (b - d) * 0.5   # h[2i,   2j]   : x1 - x2 - x3 + x4
    r01 = (a - c) * 0.5   # h[2i,   2j+1] : x1 + x2 - x3 - x4
    r10 = (b + d) * 0.5   # h[2i+1, 2j]   : x1 - x2 + x3 - x4
    r11 = (a + c) * 0.5   # h[2i+1, 2j+1] : x1 + x2 + x3 + x4

    th, w = r00.shape
    # Width-parity (q) interleave along lanes: [r_p0[0], r_p1[0], r_p0[1], ...].
    row_p0 = jnp.stack([r00, r01], axis=-1).reshape(th, 2 * w)
    row_p1 = jnp.stack([r10, r11], axis=-1).reshape(th, 2 * w)
    # Height-parity (p): the two output rows of one input row are stored
    # side-by-side along lanes; the wrapper's free reshape restores them.
    o_ref[0] = jnp.concatenate([row_p0, row_p1], axis=-1).astype(o_ref.dtype)


def _iwt_planes_kernel(x_ref, o_ref):
    """Fallback: butterfly on flattened planes; parity interleave done by XLA."""
    x1 = x_ref[0, 0].astype(jnp.float32)
    x2 = x_ref[0, 1].astype(jnp.float32)
    x3 = x_ref[0, 2].astype(jnp.float32)
    x4 = x_ref[0, 3].astype(jnp.float32)

    a = x1 + x2
    b = x1 - x2
    c = x3 + x4
    d = x3 - x4

    o_ref[0, 0] = ((b - d) * 0.5).astype(o_ref.dtype)   # (p=0, q=0)
    o_ref[0, 1] = ((a - c) * 0.5).astype(o_ref.dtype)   # (p=0, q=1)
    o_ref[0, 2] = ((b + d) * 0.5).astype(o_ref.dtype)   # (p=1, q=0)
    o_ref[0, 3] = ((a + c) * 0.5).astype(o_ref.dtype)   # (p=1, q=1)


# ---------------------------------------------------------------------------
# Tiling helpers
# ---------------------------------------------------------------------------

_TARGET_BLOCK_ELEMS = 256 * 1024   # elems per sub-band plane per grid step


def _row_align(*dtypes):
    # Sublane tiling granularity: 8 rows for 4-byte, 16 for 2-byte, 32 for 1-byte.
    return max(32 // jnp.dtype(d).itemsize for d in dtypes)


def _pick_rows(R, width, B, align, target_elems=_TARGET_BLOCK_ELEMS):
    """Row-tile size: ~target_elems per plane, multiple of `align`, >=4 grid steps."""
    if R <= align:
        return R                      # full-extent block (always legal)
    th = max(align, min(R, target_elems // max(width, 1)))
    th = max(align, (th // align) * align)
    # v7x has 2 TensorCores; make sure the all-"parallel" grid has >= 4 steps.
    while B * pl.cdiv(R, th) < 4 and th > align:
        th = max(align, ((th // 2) // align) * align)
    return th


def _vmem_limit(block_io_bytes):
    # Double-buffered in+out footprint plus headroom; stay under v7x's 64 MiB
    # physical VMEM while lifting v5e's 16 MiB default scoped budget.
    return int(min(48 << 20, max(32 << 20, 2 * block_io_bytes + (8 << 20))))


def _cost(n_in_elems, in_dtype, out_dtype):
    return pl.CostEstimate(
        flops=3 * n_in_elems,
        transcendentals=0,
        bytes_accessed=n_in_elems * jnp.dtype(in_dtype).itemsize
        + n_in_elems * jnp.dtype(out_dtype).itemsize,
    )


# ---------------------------------------------------------------------------
# Wrappers
# ---------------------------------------------------------------------------

def _iwt_xla(x, out_dtype):
    """Pure-XLA fallback for shapes that cannot be tiled densely."""
    return iwt_reference(x).astype(out_dtype)


def _iwt_fused(x, out_dtype):
    B, C4, H, W = x.shape
    C = C4 // 4
    R = C * H
    align = _row_align(x.dtype, out_dtype)
    th = _pick_rows(R, W, B, align)

    xv = x.reshape(B, 4, R, W)                      # free, contiguous reshape
    grid = (B, pl.cdiv(R, th))

    in_bytes = 4 * th * W * x.dtype.itemsize
    out_bytes = th * 4 * W * jnp.dtype(out_dtype).itemsize
    n_in = 4 * B * R * W

    out = pl.pallas_call(
        _iwt_fused_kernel,
        out_shape=jax.ShapeDtypeStruct((B, R, 4 * W), out_dtype),
        grid=grid,
        in_specs=[pl.BlockSpec((1, 4, th, W), lambda b, t: (b, 0, t, 0))],
        out_specs=pl.BlockSpec((1, th, 4 * W), lambda b, t: (b, t, 0)),
        compiler_params=pltpu.CompilerParams(
            dimension_semantics=("parallel", "parallel"),
            vmem_limit_bytes=_vmem_limit(in_bytes + out_bytes)),
        cost_estimate=_cost(n_in, x.dtype, out_dtype),
    )(xv)

    # Contiguous (free) reshape: out[b, c*H+i, p*2W+m] == h[b, c, 2i+p, m].
    return out.reshape(B, C, 2 * H, 2 * W)


def _choose_lanes(n):
    """Pick a lane-dense 2-D view (rows, lanes) of a length-n flat axis."""
    for lanes in (8192, 4096, 2048, 1024, 512, 256, 128):
        if n % lanes == 0 and (n // lanes) % 8 == 0:
            return n // lanes, lanes
    for lanes in (8192, 4096, 2048, 1024, 512, 256, 128):
        if n % lanes == 0:
            return n // lanes, lanes
    return None


def _iwt_planes(x, out_dtype):
    B, C4, H, W = x.shape
    C = C4 // 4
    n = C * H * W
    rl = _choose_lanes(n)
    if rl is None:
        return _iwt_xla(x, out_dtype)       # awkward (non-128-divisible) sizes
    R, L = rl
    align = _row_align(x.dtype, out_dtype)
    tr = _pick_rows(R, L, B, align)

    xf = x.reshape(B, 4, R, L)                      # free, contiguous reshape
    grid = (B, pl.cdiv(R, tr))

    in_bytes = 4 * tr * L * x.dtype.itemsize
    out_bytes = 4 * tr * L * jnp.dtype(out_dtype).itemsize
    n_in = 4 * B * n

    out = pl.pallas_call(
        _iwt_planes_kernel,
        out_shape=jax.ShapeDtypeStruct((B, 4, R, L), out_dtype),
        grid=grid,
        in_specs=[pl.BlockSpec((1, 4, tr, L), lambda b, t: (b, 0, t, 0))],
        out_specs=pl.BlockSpec((1, 4, tr, L), lambda b, t: (b, 0, t, 0)),
        compiler_params=pltpu.CompilerParams(
            dimension_semantics=("parallel", "parallel"),
            vmem_limit_bytes=_vmem_limit(in_bytes + out_bytes)),
        cost_estimate=_cost(n_in, x.dtype, out_dtype),
    )(xf)

    # Layout epilogue (single XLA transpose): out[b, 2p+q, (c,i,j)] -> h[b,c,2i+p,2j+q].
    y = out.reshape(B, 2, 2, C, H, W)
    return jnp.transpose(y, (0, 3, 4, 1, 5, 2)).reshape(B, C, 2 * H, 2 * W)


def iwt(x, out_dtype=jnp.float32):
    """Pallas implementation of iwt_init: (B, 4C, H, W) -> (B, C, 2H, 2W)."""
    B, C4, H, W = x.shape
    if C4 % 4 != 0:
        raise ValueError("input channel count must be divisible by 4")

    if (4 * W) % 128 == 0:
        # Fused path: parity interleave done in-kernel, lane-dense 4W-wide stores.
        try:
            return _iwt_fused(x, out_dtype)
        except Exception:
            # Graceful fallback if the in-register lane interleave does not
            # lower on this toolchain; the planes path is known-good.
            pass
    return _iwt_planes(x, out_dtype)


def iwt_reference(x):
    """Pure-JAX reference mirroring the PyTorch iwt_init."""
    B, C4, H, W = x.shape
    C = C4 // 4
    x1 = x[:, 0 * C:1 * C].astype(jnp.float32) / 2
    x2 = x[:, 1 * C:2 * C].astype(jnp.float32) / 2
    x3 = x[:, 2 * C:3 * C].astype(jnp.float32) / 2
    x4 = x[:, 3 * C:4 * C].astype(jnp.float32) / 2
    h = jnp.zeros((B, C, 2 * H, 2 * W), jnp.float32)
    h = h.at[:, :, 0::2, 0::2].set(x1 - x2 - x3 + x4)
    h = h.at[:, :, 1::2, 0::2].set(x1 - x2 + x3 - x4)
    h = h.at[:, :, 0::2, 1::2].set(x1 + x2 - x3 - x4)
    h = h.at[:, :, 1::2, 1::2].set(x1 + x2 + x3 + x4)
    return h


if __name__ == "__main__":
    # IWT has no learnable parameters (requires_grad=False, no weights).
    key = jax.random.PRNGKey(0)

    shapes = [
        (2, 16, 16, 16),   # W=16  -> flattened-planes fallback path
        (2, 16, 8, 64),    # W=64  -> fused in-kernel interleave path (4W = 256)
        (1, 4, 12, 32),    # W=32  -> fused path with ragged row tiling (R=12)
    ]
    for shp in shapes:
        key, sub = jax.random.split(key)
        x = jax.random.normal(sub, shp, dtype=jnp.float32)

        h = jax.block_until_ready(iwt(x))
        h_ref = jax.block_until_ready(iwt_reference(x))

        B, C4, H, W = shp
        assert h.shape == (B, C4 // 4, 2 * H, 2 * W), (shp, h.shape)
        assert h.dtype == jnp.float32
        assert jnp.allclose(h, h_ref, atol=1e-6, rtol=1e-6), f"mismatch for {shp}"

    print("KERNEL_OK")
</pallas_src>

<mosaic_0001>
module attributes {stable_mosaic.version = 11 : i64} {
  func.func @_iwt_planes_kernel(%arg0: i32, %arg1: i32, %arg2: memref<1x4x8x128xf32, #tpu.memory_space<vmem>>, %arg3: memref<1x4x8x128xf32, #tpu.memory_space<vmem>>) attributes {dimension_semantics = [#tpu.dimension_semantics<parallel>, #tpu.dimension_semantics<parallel>], iteration_bounds = array<i64: 2, 1>, scalar_prefetch = 0 : i64, scratch_operands = 0 : i64, tpu.core_type = #tpu.core_type<tc>, window_params = [{transform_indices = @transform_0, window_bounds = array<i64: 1, 4, 8, 128>}, {transform_indices = @transform_1, window_bounds = array<i64: 1, 4, 8, 128>}]} {
    %c0 = arith.constant 0 : index
    %c0_0 = arith.constant 0 : index
    %c0_1 = arith.constant 0 : index
    %c0_2 = arith.constant 0 : index
    %0 = vector.load %arg2[%c0, %c0_0, %c0_1, %c0_2] : memref<1x4x8x128xf32, #tpu.memory_space<vmem>>, vector<1x1x8x128xf32>
    %1 = vector.shape_cast %0 : vector<1x1x8x128xf32> to vector<8x128xf32>
    %c0_3 = arith.constant 0 : index
    %c1 = arith.constant 1 : index
    %c0_4 = arith.constant 0 : index
    %c0_5 = arith.constant 0 : index
    %2 = vector.load %arg2[%c0_3, %c1, %c0_4, %c0_5] : memref<1x4x8x128xf32, #tpu.memory_space<vmem>>, vector<1x1x8x128xf32>
    %3 = vector.shape_cast %2 : vector<1x1x8x128xf32> to vector<8x128xf32>
    %c0_6 = arith.constant 0 : index
    %c2 = arith.constant 2 : index
    %c0_7 = arith.constant 0 : index
    %c0_8 = arith.constant 0 : index
    %4 = vector.load %arg2[%c0_6, %c2, %c0_7, %c0_8] : memref<1x4x8x128xf32, #tpu.memory_space<vmem>>, vector<1x1x8x128xf32>
    %5 = vector.shape_cast %4 : vector<1x1x8x128xf32> to vector<8x128xf32>
    %c0_9 = arith.constant 0 : index
    %c3 = arith.constant 3 : index
    %c0_10 = arith.constant 0 : index
    %c0_11 = arith.constant 0 : index
    %6 = vector.load %arg2[%c0_9, %c3, %c0_10, %c0_11] : memref<1x4x8x128xf32, #tpu.memory_space<vmem>>, vector<1x1x8x128xf32>
    %7 = vector.shape_cast %6 : vector<1x1x8x128xf32> to vector<8x128xf32>
    %8 = arith.addf %1, %3 : vector<8x128xf32>
    %9 = arith.subf %1, %3 : vector<8x128xf32>
    %10 = arith.addf %5, %7 : vector<8x128xf32>
    %11 = arith.subf %5, %7 : vector<8x128xf32>
    %12 = arith.subf %9, %11 : vector<8x128xf32>
    %cst = arith.constant 5.000000e-01 : f32
    %13 = vector.broadcast %cst : f32 to vector<8x128xf32>
    %14 = arith.mulf %12, %13 : vector<8x128xf32>
    %c0_12 = arith.constant 0 : index
    %c0_13 = arith.constant 0 : index
    %c0_14 = arith.constant 0 : index
    %c0_15 = arith.constant 0 : index
    %15 = vector.load %arg3[%c0_12, %c0_13, %c0_14, %c0_15] : memref<1x4x8x128xf32, #tpu.memory_space<vmem>>, vector<1x1x8x128xf32>
    %16 = vector.shape_cast %15 : vector<1x1x8x128xf32> to vector<8x128xf32>
    %17 = vector.shape_cast %14 : vector<8x128xf32> to vector<1x1x8x128xf32>
    tpu.vector_store %arg3[%c0_12, %c0_13, %c0_14, %c0_15], %17 {strides = array<i32>} : memref<1x4x8x128xf32, #tpu.memory_space<vmem>>, vector<1x1x8x128xf32>,
    %18 = arith.subf %8, %10 : vector<8x128xf32>
    %cst_16 = arith.constant 5.000000e-01 : f32
    %19 = vector.broadcast %cst_16 : f32 to vector<8x128xf32>
    %20 = arith.mulf %18, %19 : vector<8x128xf32>
    %c0_17 = arith.constant 0 : index
    %c1_18 = arith.constant 1 : index
    %c0_19 = arith.constant 0 : index
    %c0_20 = arith.constant 0 : index
    %21 = vector.load %arg3[%c0_17, %c1_18, %c0_19, %c0_20] : memref<1x4x8x128xf32, #tpu.memory_space<vmem>>, vector<1x1x8x128xf32>
    %22 = vector.shape_cast %21 : vector<1x1x8x128xf32> to vector<8x128xf32>
    %23 = vector.shape_cast %20 : vector<8x128xf32> to vector<1x1x8x128xf32>
    tpu.vector_store %arg3[%c0_17, %c1_18, %c0_19, %c0_20], %23 {strides = array<i32>} : memref<1x4x8x128xf32, #tpu.memory_space<vmem>>, vector<1x1x8x128xf32>,
    %24 = arith.addf %9, %11 : vector<8x128xf32>
    %cst_21 = arith.constant 5.000000e-01 : f32
    %25 = vector.broadcast %cst_21 : f32 to vector<8x128xf32>
    %26 = arith.mulf %24, %25 : vector<8x128xf32>
    %c0_22 = arith.constant 0 : index
    %c2_23 = arith.constant 2 : index
    %c0_24 = arith.constant 0 : index
    %c0_25 = arith.constant 0 : index
    %27 = vector.load %arg3[%c0_22, %c2_23, %c0_24, %c0_25] : memref<1x4x8x128xf32, #tpu.memory_space<vmem>>, vector<1x1x8x128xf32>
    %28 = vector.shape_cast %27 : vector<1x1x8x128xf32> to vector<8x128xf32>
    %29 = vector.shape_cast %26 : vector<8x128xf32> to vector<1x1x8x128xf32>
    tpu.vector_store %arg3[%c0_22, %c2_23, %c0_24, %c0_25], %29 {strides = array<i32>} : memref<1x4x8x128xf32, #tpu.memory_space<vmem>>, vector<1x1x8x128xf32>,
    %30 = arith.addf %8, %10 : vector<8x128xf32>
    %cst_26 = arith.constant 5.000000e-01 : f32
    %31 = vector.broadcast %cst_26 : f32 to vector<8x128xf32>
    %32 = arith.mulf %30, %31 : vector<8x128xf32>
    %c0_27 = arith.constant 0 : index
    %c3_28 = arith.constant 3 : index
    %c0_29 = arith.constant 0 : index
    %c0_30 = arith.constant 0 : index
    %33 = vector.load %arg3[%c0_27, %c3_28, %c0_29, %c0_30] : memref<1x4x8x128xf32, #tpu.memory_space<vmem>>, vector<1x1x8x128xf32>
    %34 = vector.shape_cast %33 : vector<1x1x8x128xf32> to vector<8x128xf32>
    %35 = vector.shape_cast %32 : vector<8x128xf32> to vector<1x1x8x128xf32>
    tpu.vector_store %arg3[%c0_27, %c3_28, %c0_29, %c0_30], %35 {strides = array<i32>} : memref<1x4x8x128xf32, #tpu.memory_space<vmem>>, vector<1x1x8x128xf32>,
    return
  }
  func.func @transform_0(%arg0: i32, %arg1: i32) -> (i32, i32, i32, i32) {
    %c0_i32 = arith.constant 0 : i32
    %c0_i32_0 = arith.constant 0 : i32
    %c0_i32_1 = arith.constant 0 : i32
    return %arg0, %c0_i32, %arg1, %c0_i32_0 : i32, i32, i32, i32
  }
  func.func @transform_1(%arg0: i32, %arg1: i32) -> (i32, i32, i32, i32) {
    %c0_i32 = arith.constant 0 : i32
    %c0_i32_0 = arith.constant 0 : i32
    %c0_i32_1 = arith.constant 0 : i32
    return %arg0, %c0_i32, %arg1, %c0_i32_0 : i32, i32, i32, i32
  }
}

</mosaic_0001>

<bundles_post_ra>
// kernel: tpu_custom_call.1
= control target key start
LH: loop header
LB: loop body
LE: loop exit
PB: predicated region body
PF: predicated region fallthrough
CT: control target
= control target key end

     0   :  { %6 = vsyncpa [#allocation3], 0  ;;  %s639_s0 = inlined_call_operand.hbm [shape: f32[2,4,8,128], index: 0, kind: input, shape index: {}]   ;;  %s640_s1 = inlined_call_operand.hbm [shape: f32[2,4,8,128], index: 1, kind: output, shape index: {}]  }
   0x1   :  { %8 = vsyncpa [#allocation3 + $0x1], 0 }
   0x2   :  { %9 = vsyncpa [#allocation4], 0 }
   0x3   :  { %11 = vsyncpa [#allocation4 + $0x1], 0  ;;  %s493_s6 = smov 0   ;;  %s495_s7 = smov 0  }
   0x4   :  { %s497_s8 = smov 0   ;;  %s499_s9 = smov 0  }
   0x5   :  { %s501_s10 = smov 0   ;;  %s503_s11 = smov 0  }
   0x6 LB: > { %s278_s12 = sadd.s32 4294967295, %s475_s11   ;;  %s279_s13 = sadd.s32 4294967294, %s475_s11   ;;  %s475_s11 = sphi %s503_s11, %s17_s11   ;;  %s471_s10 = sphi %s501_s10, %s651_s10   ;;  %s467_s9 = sphi %s499_s9, %s650_s9   ;;  %s463_s8 = sphi %s497_s8, %s649_s8   ;;  %s459_s7 = sphi %s495_s7, %s648_s7   ;;  %s455_s6 = sphi %s493_s6, %s647_s6  }
   0x7   : > { %s29_s14 = sadd.s32 1, %s471_s10  ;;  %s38_s15 = sadd.s32 1, %s463_s8 }
   0x8   : > { %p31_p0 = scmp.ge.s32.totalorder %s29_s14, 2  ;;  %p45_p1 = scmp.ne.s32.totalorder %s463_s8, %s459_s7 }
   0x9   : > { %p46_p2 = scmp.eq.s32.totalorder %s475_s11, 0  ;;  %p51_p3 = scmp.ne.s32.totalorder %s459_s7, %s455_s6 }
   0xa   : > { %s653_s14 = smov (%p31_p0, %s29_s14), 0  ;;  %p52_p5 = scmp.eq.s32.totalorder %s278_s12, 0 }
   0xb   : > { %p534_p4 = por %p46_p2, %p45_p1  ;;  %s33_s17 = ssub.s32 %s471_s10, %s653_s14 }
   0xc   : > { %p77_p6 = scmp.eq.s32.totalorder %s278_s12, 1  ;;  %p36_p7 = scmp.eq.s32.totalorder %s33_s17, 0 }
   0xd   : > { %p540_p8 = por %p52_p5, %p51_p3  ;;  %p83_p10 = scmp.eq.s32.totalorder %s279_s13, 1 }
   0xe   : > { %p544_p9 = por %p77_p6, %p45_p1  ;;  %p313_p13 = scmp.lt.s32.totalorder %s475_s11, 2 }
   0xf   : > { %s549_s20 = scalar_select %p36_p7, %s463_s8, %s38_s15  }
  0x10   : > { %p551_p11 = por %p83_p10, %p51_p3  ;;  %s103_s22 = sand.u32 1, %s463_s8  }
  0x11   : > { %s282_s23 = sshll.u32 %s103_s22, 5  ;;  %s299_s24 = sshll.u32 %s471_s10, 9 }
  0x12   : > { %s114_s27 = scalar_lea.hbm %s639_s0, %s299_s24  ;;  %s107_s28 = scalar_lea.vmem [#allocation2], %s282_s23 }
  0x13   : > { %s115_s29 = sshll.u32 %s107_s28, 4  ;;  %p564_p0 = pnand %p313_p13, %p534_p4  ;;  %s116_s29 = int_to_ptr.vmem [resolvable:$true] %s115_s29 }
  0x14   : > { %p285_p1 = scmp.ge.s32.totalorder %s475_s11, 1  ;;  %s104_s2 = scalar_lea.sflag [#allocation3], %s103_s22 }
  0x15   : > { %p369_p2 = pneg %p564_p0  ;;  %s380_s3 = scalar_lea.vmem %s116_s29, 512 }
  0x16   : > { %p381_p3 = scmp.ne.s32.totalorder %s116_s29, %s380_s3  ;;  %s477_s4 = smov [#allocation2]  }
  0x17   : > { %s385_s5 = sshll.u32 %s477_s4, 4  ;;  %s386_s5 = int_to_ptr.vmem [resolvable:$false] %s385_s5 }
  0x18   : > { %p383_p5 = pnand %p381_p3, %p369_p2  ;;  %s387_s12 = scalar_lea.vmem %s386_s5, 1024 }
  0x19   : > { %p388_p7 = scmp.lt.s32.totalorder %s116_s29, %s386_s5  ;;  %p389_p10 = scmp.lt.s32.totalorder %s387_s12, %s380_s3 }
  0x1a   : > { %p384_p6 = pneg %p383_p5 }
  0x1b   : > { %p390_p12 = por %p389_p10, %p388_p7 }
  0x1d   : > { %p391_p4 = pnand %p390_p12, %p384_p6 }
  0x1f   : > { %394 = shalt.err (!%p391_p4)
}
  0x20   : > { %s478_s13 = smov 128   ;;  %s479_s15 = smov 8  }
  0x21   : > { %308 = dma.hbm_to_vmem [thread:$0]  (!%p564_p0), %s114_s27, 512, %s116_s29, %s104_s2, %s478_s13, %s478_s13, %s479_s15  }
  0x22   : > { %p123_p13 = scmp.lt.s32.totalorder %s475_s11, 3 }
  0x24   : > { %p124_p2 = pnand %p285_p1, %p123_p13 }
  0x25   : > { %s577_s16 = sand.u32 (!%p124_p2), 1, %s459_s7  }
  0x26   : > { %127 = sbr.rel (%p124_p2) target bundleno = 69 (0x45), region = 24  ;;  %s286_s17 = sshll.u32 (!%p124_p2), %s577_s16, 5 }
  0x27   : > { %s130_s22 = scalar_lea.sflag (!%p124_p2), [#allocation3], %s577_s16  ;;  %s133_s23 = scalar_lea.vmem (!%p124_p2), [#allocation2], %s286_s17 }
  0x2b   : > { %446 = dma.done.wait (%p540_p8), %s130_s22, 512  }
  0x2c   : > { %448 = vsyncadd (%p540_p8), %s130_s22, 4294966784  ;;  %v152_v0 = vld [vmem:[%s133_s23] sm:$0xff]  ;;  %v288_v1 = vld [vmem:[%s133_s23 + $0x8] sm:$0xff]  ;;  %s151_s24 = scalar_lea.vmem [#allocation5], %s286_s17  ;;  %s300_s26 = sshll.u32 %s467_s9, 9 }
  0x2d   : > { %v289_v2 = vld [vmem:[%s133_s23 + $0x10] sm:$0xff]  ;;  %v290_v3 = vld [vmem:[%s133_s23 + $0x18] sm:$0xff]  ;;  %v160_v4 = vsub.f32 %v152_v0, %v288_v1  ;;  %v159_v5 = vadd.f32 %v288_v1, %v152_v0  ;;  %s193_s25 = sshll.u32 %s151_s24, 4  ;;  %s591_s28 = scalar_lea.hbm %s640_s1, %s300_s26  ;;  %s586_s25 = int_to_ptr.vmem [resolvable:$true] %s193_s25 }
  0x2e   : > { %v162_v6 = vsub.f32 %v289_v2, %v290_v3  ;;  %v161_v7 = vadd.f32 %v290_v3, %v289_v2  ;;  %s179_s9 = scalar_lea.sflag [#allocation4], %s577_s16  ;;  %s395_s29 = scalar_lea.vmem %s586_s25, 512 }
  0x2f   : > { %p396_p8 = scmp.ne.s32.totalorder %s586_s25, %s395_s29  ;;  %s480_s30 = smov [#allocation5]  }
  0x30   : > { %v163_v8 = vsub.f32 %v160_v4, %v162_v6  ;;  %v166_v9 = vsub.f32 %v159_v5, %v161_v7  ;;  %v170_v10 = vadd.f32 %v162_v6, %v160_v4  ;;  %v174_v11 = vadd.f32 %v161_v7, %v159_v5  ;;  %s399_s2 = sshll.u32 %s480_s30, 4  ;;  %s400_s2 = int_to_ptr.vmem [resolvable:$false] %s399_s2 }
  0x31   : > { %p397_p12 = pnand %p396_p8, %p544_p9  ;;  %s401_s3 = scalar_lea.vmem %s400_s2, 1024 }
  0x32   : > { %v164_v12 = vmul.f32 0.5, %v163_v8  ;;  %v167_v13 = vmul.f32 0.5, %v166_v9  ;;  %v171_v14 = vmul.f32 0.5, %v170_v10  ;;  %v175_v15 = vmul.f32 0.5, %v174_v11  ;;  %p402_p1 = scmp.lt.s32.totalorder %s586_s25, %s400_s2  ;;  %p403_p3 = scmp.lt.s32.totalorder %s401_s3, %s395_s29 }
  0x33   : > { %p398_p0 = pneg %p397_p12 }
  0x34   : > { %165 = vst [vmem:[%s151_s24] sm:$0xff] %v164_v12  ;;  %291 = vst [vmem:[%s151_s24 + $0x8] sm:$0xff] %v167_v13  ;;  %p404_p5 = por %p403_p3, %p402_p1 }
  0x35   : > { %292 = vst [vmem:[%s151_s24 + $0x10] sm:$0xff] %v171_v14  ;;  %293 = vst [vmem:[%s151_s24 + $0x18] sm:$0xff] %v175_v15 }
  0x36   : > { %p405_p6 = pnand %p404_p5, %p398_p0 }
  0x38   : > { %408 = shalt.err (!%p405_p6)
}
  0x39   : > { %s409_s4 = scalar_lea.hbm %s591_s28, 512  ;;  %s413_s13 = scalar_lea.hbm %s640_s1, 1024 }
  0x3a   : > { %p410_p7 = scmp.ne.s32.totalorder %s591_s28, %s409_s4  ;;  %p414_p13 = scmp.lt.s32.totalorder %s591_s28, %s640_s1 }
  0x3b   : > { %p415_p2 = scmp.lt.s32.totalorder %s413_s13, %s409_s4 }
  0x3c   : > { %p411_p10 = pnand %p410_p7, %p544_p9 }
  0x3d   : > { %p416_p8 = por %p415_p2, %p414_p13 }
  0x3e   : > { %p412_p4 = pneg %p411_p10 }
  0x40   : > { %p417_p12 = pnand %p416_p8, %p412_p4 }
  0x42   : > { %420 = shalt.err (!%p417_p12)
}
  0x43   : > { %s481_s22 = smov 128   ;;  %s482_s23 = smov 8  }
  0x44   : > { %303 = dma.vmem_to_hbm [thread:$0]  (%p544_p9), %s586_s25, 512, %s591_s28, %s179_s9, %s481_s22, %s481_s22, %s482_s23  }
  0x45 PF: > { %s208_s24 = sand.u32 1, %s455_s6   ;;  %p646_p0 = scmp.ge.s32.totalorder %s475_s11, 2 }
  0x46   : > { %s209_s26 = scalar_lea.sflag [#allocation4], %s208_s24 }
  0x47   : > { %p310_p1 = pnand %p646_p0, %p551_p11 }
  0x49   : > { %p311_p3 = pneg %p310_p1 }
  0x4b   : > { %450 = dma.done.wait (%p311_p3), %s209_s26, 512  }
  0x4c   : > { %452 = vsyncadd (%p311_p3), %s209_s26, 4294966784  ;;  %s17_s11 = sadd.s32 1, %s475_s11   ;;  %s647_s6 = smov %s459_s7 }
  0x4d   : > { %p14_p5 = scmp.ge.s32.totalorder %s17_s11, 4   ;;  %s648_s7 = smov %s463_s8 }
  0x4e   : > { %s649_s8 = smov %s549_s20  ;;  %s650_s9 = smov %s471_s10 }
  0x4f   : > { %s651_s10 = smov %s653_s14  ;;  %16 = sbr.rel (!%p14_p5) target bundleno = 6 (0x6), region = 75 }
  0x54   :  { %214 = vsyncpa [#allocation3], 1 }
  0x55   :  { %216 = vsyncpa [#allocation3 + $0x1], 1 }
  0x56   :  { %217 = vsyncpa [#allocation4], 1 }
  0x57   :  { %219 = vsyncpa [#allocation4 + $0x1], 1 }

</bundles_post_ra>
